<compile_context>
chip_gen: v6e
topology: v6e:2x2x1
jax: 0.10.0
libtpu: 0.0.40
codegen_flags: <defaults>
</compile_context>

<pallas_src>
import math

import jax
import jax.numpy as jnp
from jax.experimental import pallas as pl
from jax.experimental.pallas import tpu as pltpu


def _mlp_kernel(q_ref, p_ref, w1q_ref, w1p_ref, b1_ref,
                w2_ref, b2_ref, w3_ref, b3_ref, o_ref):
    # Batch tile of query / passage embeddings; cast to bf16 for the MXU,
    # accumulate in f32.
    q = q_ref[...].astype(jnp.bfloat16)
    p = p_ref[...].astype(jnp.bfloat16)

    # fc1 (split-K over the fused concat) + bias + ReLU, all f32 elementwise.
    h1 = (jnp.dot(q, w1q_ref[...], preferred_element_type=jnp.float32)
          + jnp.dot(p, w1p_ref[...], preferred_element_type=jnp.float32)
          + b1_ref[...])
    h1 = jnp.maximum(h1, 0.0)
    # dropout(p=0.1): identity at inference time (PyTorch eval semantics).

    # fc2 + ReLU.
    h2 = jnp.dot(h1.astype(jnp.bfloat16), w2_ref[...],
                 preferred_element_type=jnp.float32) + b2_ref[...]
    h2 = jnp.maximum(h2, 0.0)
    # dropout(p=0.1): identity at inference time.

    # fc3: N=1 "matmul" done as VPU multiply + lane reduction (MXU stays free).
    logits = jnp.sum(h2 * w3_ref[...], axis=-1, keepdims=True) + b3_ref[...]
    o_ref[...] = jax.nn.sigmoid(logits)


def passage_ranking_forward(query_embed, passage_embed, params, *, block_b=512):
    """Runs the MLP as a batch-tiled Pallas kernel.

    Args:
      query_embed:   (B, E) float32 (or bfloat16).
      passage_embed: (B, E) float32 (or bfloat16).
      params: dict from init_params() — split/pre-cast weights.
      block_b: batch tile size (multiple of 8; weights stay resident).

    Returns:
      (B,) float32 relevancy scores in (0, 1).
    """
    B, E = query_embed.shape
    # Tile the batch; if B is smaller than a tile, use the full batch (block
    # shape equal to the full dim satisfies the (8,128) tiling rule).
    TB = block_b if B > block_b else B
    grid = (pl.cdiv(B, TB),)

    def batch_spec(feat):
        return pl.BlockSpec((TB, feat), lambda i: (i, 0))

    def resident_spec(arr):
        # Full-array block, constant index map -> loaded once, stays in VMEM.
        return pl.BlockSpec(arr.shape, lambda i: (0,) * arr.ndim)

    w1q, w1p, b1 = params["w1q"], params["w1p"], params["b1"]
    w2, b2 = params["w2"], params["b2"]
    w3r, b3 = params["w3r"], params["b3"]

    out = pl.pallas_call(
        _mlp_kernel,
        out_shape=jax.ShapeDtypeStruct((B, 1), jnp.float32),
        grid=grid,
        in_specs=[batch_spec(E), batch_spec(E),
                  resident_spec(w1q), resident_spec(w1p), resident_spec(b1),
                  resident_spec(w2), resident_spec(b2),
                  resident_spec(w3r), resident_spec(b3)],
        out_specs=pl.BlockSpec((TB, 1), lambda i: (i, 0)),
        compiler_params=pltpu.CompilerParams(
            dimension_semantics=("parallel",),   # v7x: shard tiles over 2 TCs
            vmem_limit_bytes=32 << 20,           # headroom on v7x's 64 MiB VMEM
        ),
    )(query_embed, passage_embed, w1q, w1p, b1, w2, b2, w3r, b3)

    # torch .squeeze(): drop the trailing singleton -> (B,)
    return out[:, 0]


def init_params(key, embedding_dim):
    """nn.Linear-style U(-1/sqrt(fan_in), +1/sqrt(fan_in)) init, laid out for the kernel."""
    def linear(key, fan_in, fan_out):
        kw, kb = jax.random.split(key)
        bound = 1.0 / math.sqrt(fan_in)
        w = jax.random.uniform(kw, (fan_in, fan_out), jnp.float32, -bound, bound)
        b = jax.random.uniform(kb, (1, fan_out), jnp.float32, -bound, bound)
        return w, b

    E = embedding_dim
    k1, k2, k3 = jax.random.split(key, 3)
    w1, b1 = linear(k1, 2 * E, 512)
    w2, b2 = linear(k2, 512, 256)
    w3, b3 = linear(k3, 256, 1)
    return {
        # fc1 split along K (query half / passage half); MXU weights pre-cast to bf16.
        "w1q": w1[:E].astype(jnp.bfloat16),
        "w1p": w1[E:].astype(jnp.bfloat16),
        "b1": b1,
        "w2": w2.astype(jnp.bfloat16),
        "b2": b2,
        # fc3 runs on the VPU (broadcast-mul + reduce), so keep it f32, row layout.
        "w3r": w3.reshape(1, 256),
        "b3": b3.reshape(1, 1),
    }


if __name__ == "__main__":
    key = jax.random.PRNGKey(0)
    k_q, k_p, k_params = jax.random.split(key, 3)

    batch = 8
    embedding_dim = 32

    query_embed = jax.random.normal(k_q, (batch, embedding_dim), jnp.float32)
    passage_embed = jax.random.normal(k_p, (batch, embedding_dim), jnp.float32)
    params = init_params(k_params, embedding_dim)

    scores = passage_ranking_forward(query_embed, passage_embed, params)
    scores = jax.block_until_ready(scores)

    # Pure-JAX reference of the same math (same bf16 operand rounding, f32 accumulate).
    qb = query_embed.astype(jnp.bfloat16)
    pb = passage_embed.astype(jnp.bfloat16)
    h1 = (jnp.dot(qb, params["w1q"], preferred_element_type=jnp.float32)
          + jnp.dot(pb, params["w1p"], preferred_element_type=jnp.float32)
          + params["b1"])
    h1 = jnp.maximum(h1, 0.0)
    h2 = jnp.dot(h1.astype(jnp.bfloat16), params["w2"],
                 preferred_element_type=jnp.float32) + params["b2"]
    h2 = jnp.maximum(h2, 0.0)
    ref = jax.nn.sigmoid(h2 @ params["w3r"].T + params["b3"])[:, 0]

    assert scores.shape == (batch,)
    assert jnp.allclose(scores, ref, atol=2e-3, rtol=2e-3), float(
        jnp.max(jnp.abs(scores - ref)))

    print("KERNEL_OK")
</pallas_src>

<mosaic_0001>
module attributes {stable_mosaic.version = 11 : i64} {
  func.func @_mlp_kernel(%arg0: i32, %arg1: memref<8x32xf32, #tpu.memory_space<vmem>>, %arg2: memref<8x32xf32, #tpu.memory_space<vmem>>, %arg3: memref<32x512xbf16, #tpu.memory_space<vmem>>, %arg4: memref<32x512xbf16, #tpu.memory_space<vmem>>, %arg5: memref<1x512xf32, #tpu.memory_space<vmem>>, %arg6: memref<512x256xbf16, #tpu.memory_space<vmem>>, %arg7: memref<1x256xf32, #tpu.memory_space<vmem>>, %arg8: memref<1x256xf32, #tpu.memory_space<vmem>>, %arg9: memref<1x1xf32, #tpu.memory_space<vmem>>, %arg10: memref<8x1xf32, #tpu.memory_space<vmem>>) attributes {dimension_semantics = [#tpu.dimension_semantics<parallel>], iteration_bounds = array<i64: 1>, scalar_prefetch = 0 : i64, scratch_operands = 0 : i64, tpu.core_type = #tpu.core_type<tc>, window_params = [{transform_indices = @transform_0, window_bounds = array<i64: 8, 32>}, {transform_indices = @transform_1, window_bounds = array<i64: 8, 32>}, {pipeline_mode = #tpu.pipeline_mode<synchronous>, transform_indices = @transform_2, window_bounds = array<i64: 32, 512>}, {pipeline_mode = #tpu.pipeline_mode<synchronous>, transform_indices = @transform_3, window_bounds = array<i64: 32, 512>}, {pipeline_mode = #tpu.pipeline_mode<synchronous>, transform_indices = @transform_4, window_bounds = array<i64: 1, 512>}, {pipeline_mode = #tpu.pipeline_mode<synchronous>, transform_indices = @transform_5, window_bounds = array<i64: 512, 256>}, {pipeline_mode = #tpu.pipeline_mode<synchronous>, transform_indices = @transform_6, window_bounds = array<i64: 1, 256>}, {pipeline_mode = #tpu.pipeline_mode<synchronous>, transform_indices = @transform_7, window_bounds = array<i64: 1, 256>}, {pipeline_mode = #tpu.pipeline_mode<synchronous>, transform_indices = @transform_8, window_bounds = array<i64: 1, 1>}, {transform_indices = @transform_9, window_bounds = array<i64: 8, 1>}]} {
    %c0 = arith.constant 0 : index
    %c0_0 = arith.constant 0 : index
    %0 = vector.load %arg1[%c0, %c0_0] : memref<8x32xf32, #tpu.memory_space<vmem>>, vector<8x32xf32>
    %1 = arith.truncf %0 : vector<8x32xf32> to vector<8x32xbf16>
    %c0_1 = arith.constant 0 : index
    %c0_2 = arith.constant 0 : index
    %2 = vector.load %arg2[%c0_1, %c0_2] : memref<8x32xf32, #tpu.memory_space<vmem>>, vector<8x32xf32>
    %3 = arith.truncf %2 : vector<8x32xf32> to vector<8x32xbf16>
    %c0_3 = arith.constant 0 : index
    %c0_4 = arith.constant 0 : index
    %4 = vector.load %arg3[%c0_3, %c0_4] : memref<32x512xbf16, #tpu.memory_space<vmem>>, vector<32x512xbf16>
    %cst = arith.constant dense<0.000000e+00> : vector<8x512xf32>
    %5 = tpu.matmul %1, %4, %cst {dimension_numbers = #tpu.dot_dimension_numbers<[1], [0], [0], [1], [0, 0, 1, 1], [], []>} : vector<8x32xbf16>, vector<32x512xbf16>, vector<8x512xf32> -> vector<8x512xf32>
    %c0_5 = arith.constant 0 : index
    %c0_6 = arith.constant 0 : index
    %6 = vector.load %arg4[%c0_5, %c0_6] : memref<32x512xbf16, #tpu.memory_space<vmem>>, vector<32x512xbf16>
    %cst_7 = arith.constant dense<0.000000e+00> : vector<8x512xf32>
    %7 = tpu.matmul %3, %6, %cst_7 {dimension_numbers = #tpu.dot_dimension_numbers<[1], [0], [0], [1], [0, 0, 1, 1], [], []>} : vector<8x32xbf16>, vector<32x512xbf16>, vector<8x512xf32> -> vector<8x512xf32>
    %8 = arith.addf %5, %7 : vector<8x512xf32>
    %c0_8 = arith.constant 0 : index
    %c0_9 = arith.constant 0 : index
    %9 = vector.load %arg5[%c0_8, %c0_9] : memref<1x512xf32, #tpu.memory_space<vmem>>, vector<1x512xf32>
    %10 = vector.broadcast %9 : vector<1x512xf32> to vector<8x512xf32>
    %11 = arith.addf %8, %10 : vector<8x512xf32>
    %cst_10 = arith.constant 0.000000e+00 : f32
    %12 = vector.broadcast %cst_10 : f32 to vector<8x512xf32>
    %13 = arith.maximumf %11, %12 : vector<8x512xf32>
    %14 = arith.truncf %13 : vector<8x512xf32> to vector<8x512xbf16>
    %c0_11 = arith.constant 0 : index
    %c0_12 = arith.constant 0 : index
    %15 = vector.load %arg6[%c0_11, %c0_12] : memref<512x256xbf16, #tpu.memory_space<vmem>>, vector<512x256xbf16>
    %cst_13 = arith.constant dense<0.000000e+00> : vector<8x256xf32>
    %16 = tpu.matmul %14, %15, %cst_13 {dimension_numbers = #tpu.dot_dimension_numbers<[1], [0], [0], [1], [0, 0, 1, 1], [], []>} : vector<8x512xbf16>, vector<512x256xbf16>, vector<8x256xf32> -> vector<8x256xf32>
    %c0_14 = arith.constant 0 : index
    %c0_15 = arith.constant 0 : index
    %17 = vector.load %arg7[%c0_14, %c0_15] : memref<1x256xf32, #tpu.memory_space<vmem>>, vector<1x256xf32>
    %18 = vector.broadcast %17 : vector<1x256xf32> to vector<8x256xf32>
    %19 = arith.addf %16, %18 : vector<8x256xf32>
    %cst_16 = arith.constant 0.000000e+00 : f32
    %20 = vector.broadcast %cst_16 : f32 to vector<8x256xf32>
    %21 = arith.maximumf %19, %20 : vector<8x256xf32>
    %c0_17 = arith.constant 0 : index
    %c0_18 = arith.constant 0 : index
    %22 = vector.load %arg8[%c0_17, %c0_18] : memref<1x256xf32, #tpu.memory_space<vmem>>, vector<1x256xf32>
    %23 = vector.broadcast %22 : vector<1x256xf32> to vector<8x256xf32>
    %24 = arith.mulf %21, %23 : vector<8x256xf32>
    %cst_19 = arith.constant dense<0.000000e+00> : vector<8xf32>
    %25 = vector.multi_reduction <add>, %24, %cst_19 [1] : vector<8x256xf32> to vector<8xf32>
    %26 = vector.shape_cast %25 : vector<8xf32> to vector<8x1xf32>
    %c0_20 = arith.constant 0 : index
    %c0_21 = arith.constant 0 : index
    %27 = vector.load %arg9[%c0_20, %c0_21] : memref<1x1xf32, #tpu.memory_space<vmem>>, vector<1x1xf32>
    %28 = vector.broadcast %27 : vector<1x1xf32> to vector<8x1xf32>
    %29 = arith.addf %26, %28 : vector<8x1xf32>
    %30 = arith.negf %29 : vector<8x1xf32>
    %31 = math.exp %30 : vector<8x1xf32>
    %cst_22 = arith.constant 1.000000e+00 : f32
    %32 = vector.broadcast %cst_22 : f32 to vector<8x1xf32>
    %33 = arith.addf %32, %31 : vector<8x1xf32>
    %34 = arith.divf %32, %33 : vector<8x1xf32>
    %c0_23 = arith.constant 0 : index
    %c0_24 = arith.constant 0 : index
    %35 = vector.load %arg10[%c0_23, %c0_24] : memref<8x1xf32, #tpu.memory_space<vmem>>, vector<8x1xf32>
    tpu.vector_store %arg10[%c0_23, %c0_24], %34 {strides = array<i32>} : memref<8x1xf32, #tpu.memory_space<vmem>>, vector<8x1xf32>,
    return
  }
  func.func @transform_0(%arg0: i32) -> (i32, i32) {
    %c0_i32 = arith.constant 0 : i32
    %c0_i32_0 = arith.constant 0 : i32
    return %arg0, %c0_i32 : i32, i32
  }
  func.func @transform_1(%arg0: i32) -> (i32, i32) {
    %c0_i32 = arith.constant 0 : i32
    %c0_i32_0 = arith.constant 0 : i32
    return %arg0, %c0_i32 : i32, i32
  }
  func.func @transform_2(%arg0: i32) -> (i32, i32) {
    %c0_i32 = arith.constant 0 : i32
    %c0_i32_0 = arith.constant 0 : i32
    %c0_i32_1 = arith.constant 0 : i32
    return %c0_i32, %c0_i32_0 : i32, i32
  }
  func.func @transform_3(%arg0: i32) -> (i32, i32) {
    %c0_i32 = arith.constant 0 : i32
    %c0_i32_0 = arith.constant 0 : i32
    %c0_i32_1 = arith.constant 0 : i32
    return %c0_i32, %c0_i32_0 : i32, i32
  }
  func.func @transform_4(%arg0: i32) -> (i32, i32) {
    %c0_i32 = arith.constant 0 : i32
    %c0_i32_0 = arith.constant 0 : i32
    %c0_i32_1 = arith.constant 0 : i32
    return %c0_i32, %c0_i32_0 : i32, i32
  }
  func.func @transform_5(%arg0: i32) -> (i32, i32) {
    %c0_i32 = arith.constant 0 : i32
    %c0_i32_0 = arith.constant 0 : i32
    %c0_i32_1 = arith.constant 0 : i32
    return %c0_i32, %c0_i32_0 : i32, i32
  }
  func.func @transform_6(%arg0: i32) -> (i32, i32) {
    %c0_i32 = arith.constant 0 : i32
    %c0_i32_0 = arith.constant 0 : i32
    %c0_i32_1 = arith.constant 0 : i32
    return %c0_i32, %c0_i32_0 : i32, i32
  }
  func.func @transform_7(%arg0: i32) -> (i32, i32) {
    %c0_i32 = arith.constant 0 : i32
    %c0_i32_0 = arith.constant 0 : i32
    %c0_i32_1 = arith.constant 0 : i32
    return %c0_i32, %c0_i32_0 : i32, i32
  }
  func.func @transform_8(%arg0: i32) -> (i32, i32) {
    %c0_i32 = arith.constant 0 : i32
    %c0_i32_0 = arith.constant 0 : i32
    %c0_i32_1 = arith.constant 0 : i32
    return %c0_i32, %c0_i32_0 : i32, i32
  }
  func.func @transform_9(%arg0: i32) -> (i32, i32) {
    %c0_i32 = arith.constant 0 : i32
    %c0_i32_0 = arith.constant 0 : i32
    return %arg0, %c0_i32 : i32, i32
  }
}

</mosaic_0001>

<bundles_post_ra>
// kernel: tpu_custom_call.1
= control target key start
LH: loop header
LB: loop body
LE: loop exit
PB: predicated region body
PF: predicated region fallthrough
CT: control target
= control target key end

     0   :  { %s1344_s0 = inlined_call_operand.hbm [shape: f32[8,32], index: 0, kind: input, shape index: {}]   ;;  %s1345_s1 = inlined_call_operand.hbm [shape: f32[8,32], index: 1, kind: input, shape index: {}]   ;;  %s1346_s2 = inlined_call_operand.hbm [shape: bf16[32,512], index: 2, kind: input, shape index: {}]   ;;  %s1347_s3 = inlined_call_operand.hbm [shape: bf16[32,512], index: 3, kind: input, shape index: {}]   ;;  %s1348_s4 = inlined_call_operand.vmem [shape: f32[1,512], index: 4, kind: input, shape index: {}]   ;;  %s1349_s5 = inlined_call_operand.hbm [shape: bf16[512,256], index: 5, kind: input, shape index: {}]   ;;  %s1350_s6 = inlined_call_operand.vmem [shape: f32[1,256], index: 6, kind: input, shape index: {}]   ;;  %s1351_s7 = inlined_call_operand.vmem [shape: f32[1,256], index: 7, kind: input, shape index: {}]   ;;  %s1352_s8 = inlined_call_operand.<no memory space> [shape: f32[1,1], index: 8, kind: input, shape index: {}]   ;;  %s1353_s9 = inlined_call_operand.vmem [shape: f32[8,1], index: 9, kind: output, shape index: {}]  }
   0x1   :  { %v14_v0 = vstv %s1352_s8 }
   0x2   :  { %15 = vst [vmem:[#allocation2] sm:$0x1] %v14_v0 }
   0x3   :  { %16 = vsyncpa [#allocation4], 0 }
   0x4   :  { %17 = vsyncpa [#allocation6], 0 }
   0x5   :  { %18 = vsyncpa [#allocation9], 0  ;;  %s1250_s11 = smov [#allocation5]  }
   0x6   :  { %s35_s12 = sshll.u32 %s1250_s11, 4  ;;  %s36_s12 = int_to_ptr.vmem [resolvable:$true] %s35_s12 }
   0x7   :  { %s1152_s13 = scalar_lea.vmem %s36_s12, 128  ;;  %p1157_p1 = scmp.lt.s32.totalorder %s36_s12, %s36_s12 }
   0x8   :  { %p1153_p0 = scmp.ne.s32.totalorder %s36_s12, %s1152_s13  ;;  %p1158_p2 = scmp.lt.s32.totalorder %s1152_s13, %s1152_s13 }
   0xa   :  { %p1159_p3 = por %p1158_p2, %p1157_p1 }
   0xc   :  { %p1160_p4 = pnand %p1159_p3, %p1153_p0 }
   0xe   :  { %1163 = shalt.err (!%p1160_p4)
}
   0xf   :  { %38 = dma.hbm_to_vmem [thread:$0]  %s1345_s1, 128, %s36_s12, [#allocation6]  }
  0x10   :  { %s1251_s16 = smov [#allocation8]   ;;  %s1252_s17 = smov [#allocation3]  }
  0x11   :  { %s56_s8 = sshll.u32 %s1251_s16, 4  ;;  %s25_s18 = sshll.u32 %s1252_s17, 4  ;;  %s57_s8 = int_to_ptr.vmem [resolvable:$true] %s56_s8  ;;  %s26_s18 = int_to_ptr.vmem [resolvable:$true] %s25_s18 }
  0x12   :  { %s1172_s19 = scalar_lea.vmem %s57_s8, 1024  ;;  %p1177_p6 = scmp.lt.s32.totalorder %s57_s8, %s57_s8 }
  0x13   :  { %p1173_p5 = scmp.ne.s32.totalorder %s57_s8, %s1172_s19  ;;  %p1178_p7 = scmp.lt.s32.totalorder %s1172_s19, %s1172_s19 }
  0x15   :  { %p1179_p8 = por %p1178_p7, %p1177_p6 }
  0x17   :  { %p1180_p9 = pnand %p1179_p8, %p1173_p5 }
  0x19   :  { %1183 = shalt.err (!%p1180_p9)
}
  0x1a   :  { %s1253_s20 = smov 256   ;;  %s1254_s21 = smov 16  }
  0x1b   :  { %62 = dma.hbm_to_vmem [thread:$0]  %s1347_s3, 1024, %s57_s8, [#allocation9], %s1253_s20, %s1253_s20, %s1254_s21  }
  0x1c   :  { %s1192_s1 = scalar_lea.vmem %s26_s18, 128  ;;  %p1197_p11 = scmp.lt.s32.totalorder %s26_s18, %s26_s18 }
  0x1d   :  { %p1193_p10 = scmp.ne.s32.totalorder %s26_s18, %s1192_s1  ;;  %p1198_p12 = scmp.lt.s32.totalorder %s1192_s1, %s1192_s1 }
  0x1f   :  { %p1199_p13 = por %p1198_p12, %p1197_p11 }
  0x21   :  { %p1200_p0 = pnand %p1199_p13, %p1193_p10 }
  0x23   :  { %1203 = shalt.err (!%p1200_p0)
}
  0x24   :  { %28 = dma.hbm_to_vmem [thread:$0]  %s1344_s0, 128, %s26_s18, [#allocation4]  }
  0x25   :  { %s1255_s26 = smov [#allocation7]   ;;  %s1256_s28 = smov [#allocation10]  }
  0x26   :  { %s44_s27 = sshll.u32 %s1255_s26, 4  ;;  %s70_s29 = sshll.u32 %s1256_s28, 4  ;;  %s45_s27 = int_to_ptr.vmem [resolvable:$true] %s44_s27  ;;  %s71_s29 = int_to_ptr.vmem [resolvable:$true] %s70_s29 }
  0x27   :  { %s1212_s30 = scalar_lea.vmem %s45_s27, 1024  ;;  %p1217_p2 = scmp.lt.s32.totalorder %s45_s27, %s45_s27 }
  0x28   :  { %p1213_p1 = scmp.ne.s32.totalorder %s45_s27, %s1212_s30  ;;  %p1218_p3 = scmp.lt.s32.totalorder %s1212_s30, %s1212_s30 }
  0x2a   :  { %p1219_p4 = por %p1218_p3, %p1217_p2 }
  0x2c   :  { %p1220_p5 = pnand %p1219_p4, %p1213_p1 }
  0x2e   :  { %1223 = shalt.err (!%p1220_p5)
}
  0x2f   :  { %50 = dma.hbm_to_vmem [thread:$0]  %s1346_s2, 1024, %s45_s27, [#allocation6], %s1253_s20, %s1253_s20, %s1254_s21  }
  0x30   :  { %s1232_s11 = scalar_lea.vmem %s71_s29, 8192  ;;  %p1237_p7 = scmp.lt.s32.totalorder %s71_s29, %s71_s29 }
  0x31   :  { %p1233_p6 = scmp.ne.s32.totalorder %s71_s29, %s1232_s11  ;;  %p1238_p8 = scmp.lt.s32.totalorder %s1232_s11, %s1232_s11 }
  0x33   :  { %p1239_p9 = por %p1238_p8, %p1237_p7 }
  0x35   :  { %p1240_p10 = pnand %p1239_p9, %p1233_p6 }
  0x37   :  { %1243 = shalt.err (!%p1240_p10)
}
  0x38   :  { %s1257_s0 = smov 128   ;;  %s1258_s12 = smov 8  }
  0x39   :  { %76 = dma.hbm_to_vmem [thread:$0]  %s1349_s5, 8192, %s71_s29, [#allocation9], %s1257_s0, %s1257_s0, %s1258_s12  }
  0x3a   :  { %1244 = dma.done.wait [#allocation4], 128  }
  0x3b   :  { %1245 = vsyncadd [#allocation4], 4294967168 }
  0x3c   :  { %1246 = dma.done.wait [#allocation6], 1152  }
  0x3d   :  { %1247 = vsyncadd [#allocation6], 4294966144 }
  0x3e   :  { %1248 = dma.done.wait [#allocation9], 9216  }
  0x3f   :  { %1249 = vsyncadd [#allocation9], 4294958080  ;;  %v1259_v1 = vmov 0   ;;  %v1020_v2 = vld [vmem:[#allocation8 + $0x24] ss:$16 sps:$4 sm:$0xff]   ;;  %v101_v10 = vld [vmem:[#allocation5] sm:$0xff] }
  0x40   :  { %195 = vmatprep.mubr.bf16.mxu0 %v1259_v1  ;;  %236 = vmatprep.mubr.bf16.mxu1 %v1259_v1  ;;  %v1022_v3 = vld [vmem:[#allocation8 + $0x2c] ss:$16 sps:$4 sm:$0xff]   ;;  %v1024_v4 = vld [vmem:[#allocation8 + $0x20] ss:$16 sps:$4 sm:$0xff]   ;;  %v1025_v5 = vld [vmem:[#allocation8 + $0x28] ss:$16 sps:$4 sm:$0xff]   ;;  %v102_v13 = vpack.c.bf16 %v101_v10, %v101_v10 }
  0x41   :  { %175 = vmatprep.subr.bf16.mxu0 %v1020_v2  ;;  %216 = vmatprep.subr.bf16.mxu1 %v1022_v3  ;;  %v1026_v6 = vld [vmem:[#allocation8 + $0x4] ss:$16 sps:$4 sm:$0xff]   ;;  %v1028_v7 = vld [vmem:[#allocation8 + $0xc] ss:$16 sps:$4 sm:$0xff]   ;;  %v1030_v8 = vld [vmem:[#allocation8] ss:$16 sps:$4 sm:$0xff]  }
  0x42   :  { %176 = vmatpush1.bf16.msra.mxu0 %v1024_v4  ;;  %217 = vmatpush1.bf16.msra.mxu1 %v1025_v5  ;;  %v1031_v9 = vld [vmem:[#allocation8 + $0x8] ss:$16 sps:$4 sm:$0xff]   ;;  %v1032_v11 = vld [vmem:[#allocation7 + $0x20] ss:$16 sps:$4 sm:$0xff]   ;;  %v1034_v12 = vld [vmem:[#allocation7 + $0x24] ss:$16 sps:$4 sm:$0xff]  }
  0x43   :  { %177 = vmatprep.subr.bf16.mxu0 %v1026_v6  ;;  %218 = vmatprep.subr.bf16.mxu1 %v1028_v7  ;;  %v1035_v14 = vld [vmem:[#allocation7 + $0x28] ss:$16 sps:$4 sm:$0xff]   ;;  %vm159_vm0 = vcmask 261120   ;;  %v1037_v15 = vld [vmem:[#allocation7 + $0x2c] ss:$16 sps:$4 sm:$0xff]   ;;  %v99_v20 = vld [vmem:[#allocation3] sm:$0xff] }
  0x44   :  { %v1040_v16 = vld [vmem:[#allocation7 + $0x4] ss:$16 sps:$4 sm:$0xff]   ;;  %v1043_v17 = vld [vmem:[#allocation7 + $0xc] ss:$16 sps:$4 sm:$0xff]   ;;  %v1038_v18 = vld [vmem:[#allocation7] ss:$16 sps:$4 sm:$0xff]   ;;  %v100_v23 = vpack.c.bf16 %v99_v20, %v99_v20 }
  0x45   :  { %v1041_v19 = vld [vmem:[#allocation7 + $0x8] ss:$16 sps:$4 sm:$0xff]   ;;  %v1046_v21 = vld [vmem:[#allocation10 + $0x74] ss:$8 sps:$4 sm:$0xff]   ;;  %v1052_v26 = vld [vmem:[#allocation10 + $0x64] ss:$8 sps:$4 sm:$0xff]  }
  0x46   :  { %178 = vmatpush1.bf16.msra.mxu0 %v1030_v8  ;;  %219 = vmatpush1.bf16.msra.mxu1 %v1031_v9  ;;  %v1049_v22 = vld [vmem:[#allocation10 + $0x174] ss:$8 sps:$4 sm:$0xff]   ;;  %v1044_v24 = vld [vmem:[#allocation10 + $0x70] ss:$8 sps:$4 sm:$0xff]   ;;  %v1055_v27 = vld [vmem:[#allocation10 + $0x164] ss:$8 sps:$4 sm:$0xff]  }
  0x47   :  { %300 = vmatprep.subr.bf16.mxu0 %v1034_v12  ;;  %341 = vmatprep.subr.bf16.mxu1 %v1037_v15  ;;  %v1047_v25 = vld [vmem:[#allocation10 + $0x170] ss:$8 sps:$4 sm:$0xff]   ;;  %v1050_v28 = vld [vmem:[#allocation10 + $0x60] ss:$8 sps:$4 sm:$0xff]   ;;  %v1058_v30 = vld [vmem:[#allocation10 + $0x54] ss:$8 sps:$4 sm:$0xff]  }
  0x48   :  { %v1053_v29 = vld [vmem:[#allocation10 + $0x160] ss:$8 sps:$4 sm:$0xff]   ;;  %v1061_v31 = vld [vmem:[#allocation10 + $0x154] ss:$8 sps:$4 sm:$0xff]   ;;  %v1056_v32 = vld [vmem:[#allocation10 + $0x50] ss:$8 sps:$4 sm:$0xff]  }
  0x49   :  { %932 = vmatmul.mubr.msk.bf16.vlgmr.msra.gmra.mxu0 %vm159_vm0, %v102_v13  ;;  %933 = vmatmul.mubr.msk.bf16.vlgmr.msra.gmra.mxu1 %vm159_vm0, %v102_v13  ;;  %v1059_v33 = vld [vmem:[#allocation10 + $0x150] ss:$8 sps:$4 sm:$0xff]   ;;  %v1064_v34 = vld [vmem:[#allocation10 + $0x44] ss:$8 sps:$4 sm:$0xff]   ;;  %v1062_v36 = vld [vmem:[#allocation10 + $0x40] ss:$8 sps:$4 sm:$0xff]  }
  0x4a   :  { %301 = vmatpush1.bf16.msra.mxu0 %v1032_v11  ;;  %342 = vmatpush1.bf16.msra.mxu1 %v1035_v14  ;;  %v1067_v35 = vld [vmem:[#allocation10 + $0x144] ss:$8 sps:$4 sm:$0xff]   ;;  %v1065_v37 = vld [vmem:[#allocation10 + $0x140] ss:$8 sps:$4 sm:$0xff]   ;;  %v1070_v38 = vld [vmem:[#allocation10 + $0x34] ss:$8 sps:$4 sm:$0xff]  }
  0x4b   :  { %302 = vmatprep.subr.bf16.mxu0 %v1040_v16  ;;  %343 = vmatprep.subr.bf16.mxu1 %v1043_v17  ;;  %v1073_v39 = vld [vmem:[#allocation10 + $0x134] ss:$8 sps:$4 sm:$0xff]   ;;  %v1068_v40 = vld [vmem:[#allocation10 + $0x30] ss:$8 sps:$4 sm:$0xff]   ;;  %v1076_v42 = vld [vmem:[#allocation10 + $0x24] ss:$8 sps:$4 sm:$0xff]  }
  0x4c   :  { %320 = vmatprep.mubr.bf16.mxu0 %v1259_v1  ;;  %361 = vmatprep.mubr.bf16.mxu1 %v1259_v1  ;;  %v1071_v41 = vld [vmem:[#allocation10 + $0x130] ss:$8 sps:$4 sm:$0xff]   ;;  %v1079_v43 = vld [vmem:[#allocation10 + $0x124] ss:$8 sps:$4 sm:$0xff]   ;;  %v1074_v44 = vld [vmem:[#allocation10 + $0x20] ss:$8 sps:$4 sm:$0xff]  }
  0x4d   :  { %v1077_v45 = vld [vmem:[#allocation10 + $0x120] ss:$8 sps:$4 sm:$0xff]   ;;  %v1082_v46 = vld [vmem:[#allocation10 + $0x14] ss:$8 sps:$4 sm:$0xff]   ;;  %v1080_v48 = vld [vmem:[#allocation10 + $0x10] ss:$8 sps:$4 sm:$0xff]  }
  0x4e   :  { %303 = vmatpush1.bf16.msra.mxu0 %v1038_v18  ;;  %344 = vmatpush1.bf16.msra.mxu1 %v1041_v19  ;;  %v1085_v47 = vld [vmem:[#allocation10 + $0x114] ss:$8 sps:$4 sm:$0xff]   ;;  %v1083_v49 = vld [vmem:[#allocation10 + $0x110] ss:$8 sps:$4 sm:$0xff]   ;;  %v1088_v50 = vld [vmem:[#allocation10 + $0x4] ss:$8 sps:$4 sm:$0xff]  }
  0x4f   :  { %800 = vmatprep.subr.bf16.mxu0 %v1046_v21  ;;  %841 = vmatprep.subr.bf16.mxu1 %v1049_v22  ;;  %v1091_v51 = vld [vmem:[#allocation10 + $0x104] ss:$8 sps:$4 sm:$0xff]   ;;  %v1086_v52 = vld [vmem:[#allocation10] ss:$8 sps:$4 sm:$0xff]   ;;  %v1094_v54 = vld [vmem:[#allocation10 + $0xf4] ss:$8 sps:$4 sm:$0xff]   ;;  %v372_v22 = vlaneseq }
  0x50   :  { %v1089_v53 = vld [vmem:[#allocation10 + $0x100] ss:$8 sps:$4 sm:$0xff]   ;;  %v1097_v55 = vld [vmem:[#allocation10 + $0x1f4] ss:$8 sps:$4 sm:$0xff]   ;;  %v1092_v56 = vld [vmem:[#allocation10 + $0xf0] ss:$8 sps:$4 sm:$0xff]  }
  0x51   :  { %942 = vmatmul.mubr.msk.bf16.vlgmr.msra.gmra.mxu0 %vm159_vm0, %v100_v23  ;;  %943 = vmatmul.mubr.msk.bf16.vlgmr.msra.gmra.mxu1 %vm159_vm0, %v100_v23  ;;  %v1095_v57 = vld [vmem:[#allocation10 + $0x1f0] ss:$8 sps:$4 sm:$0xff]   ;;  %v1100_v58 = vld [vmem:[#allocation10 + $0xe4] ss:$8 sps:$4 sm:$0xff]   ;;  %v1098_v60 = vld [vmem:[#allocation10 + $0xe0] ss:$8 sps:$4 sm:$0xff]  }
  0x52   :  { %801 = vmatpush1.bf16.msra.mxu0 %v1044_v24  ;;  %842 = vmatpush1.bf16.msra.mxu1 %v1047_v25  ;;  %v1103_v59 = vld [vmem:[#allocation10 + $0x1e4] ss:$8 sps:$4 sm:$0xff]   ;;  %v1101_v61 = vld [vmem:[#allocation10 + $0x1e0] ss:$8 sps:$4 sm:$0xff]   ;;  %v1106_v62 = vld [vmem:[#allocation10 + $0xd4] ss:$8 sps:$4 sm:$0xff]  }
  0x53   :  { %802 = vmatprep.subr.bf16.mxu0 %v1052_v26  ;;  %843 = vmatprep.subr.bf16.mxu1 %v1055_v27  ;;  %v1109_v63 = vld [vmem:[#allocation10 + $0x1d4] ss:$8 sps:$4 sm:$0xff]   ;;  %v1104_v0 = vld [vmem:[#allocation10 + $0xd0] ss:$8 sps:$4 sm:$0xff]   ;;  %v1112_v2 = vld [vmem:[#allocation10 + $0xc4] ss:$8 sps:$4 sm:$0xff]  }
  0x54   :  { %v1107_v1 = vld [vmem:[#allocation10 + $0x1d0] ss:$8 sps:$4 sm:$0xff]   ;;  %v1115_v3 = vld [vmem:[#allocation10 + $0x1c4] ss:$8 sps:$4 sm:$0xff]   ;;  %v1110_v4 = vld [vmem:[#allocation10 + $0xc0] ss:$8 sps:$4 sm:$0xff]  }
  0x55   :  { %v1113_v5 = vld [vmem:[#allocation10 + $0x1c0] ss:$8 sps:$4 sm:$0xff]   ;;  %v1118_v6 = vld [vmem:[#allocation10 + $0xb4] ss:$8 sps:$4 sm:$0xff]   ;;  %v1116_v8 = vld [vmem:[#allocation10 + $0xb0] ss:$8 sps:$4 sm:$0xff]  }
  0x56   :  { %803 = vmatpush1.bf16.msra.mxu0 %v1050_v28  ;;  %844 = vmatpush1.bf16.msra.mxu1 %v1053_v29  ;;  %v1121_v7 = vld [vmem:[#allocation10 + $0x1b4] ss:$8 sps:$4 sm:$0xff]   ;;  %v1119_v9 = vld [vmem:[#allocation10 + $0x1b0] ss:$8 sps:$4 sm:$0xff]   ;;  %v1124_v10 = vld [vmem:[#allocation10 + $0xa4] ss:$8 sps:$4 sm:$0xff]  }
  0x57   :  { %804 = vmatprep.subr.bf16.mxu0 %v1058_v30  ;;  %845 = vmatprep.subr.bf16.mxu1 %v1061_v31  ;;  %v1127_v11 = vld [vmem:[#allocation10 + $0x1a4] ss:$8 sps:$4 sm:$0xff]   ;;  %v1122_v12 = vld [vmem:[#allocation10 + $0xa0] ss:$8 sps:$4 sm:$0xff]   ;;  %v1130_v14 = vld [vmem:[#allocation10 + $0x94] ss:$8 sps:$4 sm:$0xff]  }
  0x58   :  { %v1125_v13 = vld [vmem:[#allocation10 + $0x1a0] ss:$8 sps:$4 sm:$0xff]   ;;  %v1133_v15 = vld [vmem:[#allocation10 + $0x194] ss:$8 sps:$4 sm:$0xff]   ;;  %v1128_v16 = vld [vmem:[#allocation10 + $0x90] ss:$8 sps:$4 sm:$0xff]  }
  0x59   :  { %v1131_v17 = vld [vmem:[#allocation10 + $0x190] ss:$8 sps:$4 sm:$0xff]   ;;  %v1136_v18 = vld [vmem:[#allocation10 + $0x84] ss:$8 sps:$4 sm:$0xff]   ;;  %v1134_v20 = vld [vmem:[#allocation10 + $0x80] ss:$8 sps:$4 sm:$0xff]  }
  0x5a   :  { %805 = vmatpush1.bf16.msra.mxu0 %v1056_v32  ;;  %846 = vmatpush1.bf16.msra.mxu1 %v1059_v33  ;;  %v1139_v19 = vld [vmem:[#allocation10 + $0x184] ss:$8 sps:$4 sm:$0xff]   ;;  %v1137_v21 = vld [vmem:[#allocation10 + $0x180] ss:$8 sps:$4 sm:$0xff]   ;;  %v373_v23 = vshrl.u32 %v372_v22, 7  ;;  %vm915_vm1 = vcmask 7168  }
  0x5b   :  { %806 = vmatprep.subr.bf16.mxu0 %v1064_v34  ;;  %847 = vmatprep.subr.bf16.mxu1 %v1067_v35  ;;  %v370_v32 = vld [vmem:[%s1348_s4] sm:$0xf] }
  0x5c   :  { %v374_v28 = vsub.s32 0, %v373_v23  ;;  %v382_v29 = vsub.s32 2, %v373_v23  ;;  %v378_v33 = vsub.s32 1, %v373_v23  ;;  %v386_v34 = vsub.s32 3, %v373_v23 }
  0x5e   :  { %807 = vmatpush1.bf16.msra.mxu0 %v1062_v36  ;;  %848 = vmatpush1.bf16.msra.mxu1 %v1065_v37  ;;  %v375_v37 = vrot.slane %v370_v32, %v374_v28 }
  0x5f   :  { %808 = vmatprep.subr.bf16.mxu0 %v1070_v38  ;;  %849 = vmatprep.subr.bf16.mxu1 %v1073_v39  ;;  %v383_v38 = vrot.slane %v370_v32, %v382_v29 }
  0x62   :  { %809 = vmatpush1.bf16.msra.mxu0 %v1068_v40  ;;  %850 = vmatpush1.bf16.msra.mxu1 %v1071_v41 }
  0x63   :  { %810 = vmatprep.subr.bf16.mxu0 %v1076_v42  ;;  %851 = vmatprep.subr.bf16.mxu1 %v1079_v43  ;;  %v379_v43 = vrot.slane %v370_v32, %v378_v33 }
  0x66   :  { %811 = vmatpush1.bf16.msra.mxu0 %v1074_v44  ;;  %852 = vmatpush1.bf16.msra.mxu1 %v1077_v45  ;;  %v387_v44 = vrot.slane %v370_v32, %v386_v34 }
  0x67   :  { %812 = vmatprep.subr.bf16.mxu0 %v1082_v46  ;;  %853 = vmatprep.subr.bf16.mxu1 %v1085_v47 }
  0x6a   :  { %813 = vmatpush1.bf16.msra.mxu0 %v1080_v48  ;;  %854 = vmatpush1.bf16.msra.mxu1 %v1083_v49 }
  0x6b   :  { %814 = vmatprep.subr.bf16.mxu0 %v1088_v50  ;;  %855 = vmatprep.subr.bf16.mxu1 %v1091_v51 }
  0x6e   :  { %815 = vmatpush1.bf16.msra.mxu0 %v1086_v52  ;;  %856 = vmatpush1.bf16.msra.mxu1 %v1089_v53 }
  0x6f   :  { %816 = vmatprep.subr.bf16.mxu0 %v1094_v54  ;;  %857 = vmatprep.subr.bf16.mxu1 %v1097_v55 }
  0x72   :  { %817 = vmatpush2.bf16.msra.mxu0 %v1092_v56  ;;  %858 = vmatpush2.bf16.msra.mxu1 %v1095_v57 }
  0x73   :  { %818 = vmatprep.subr.bf16.mxu0 %v1100_v58  ;;  %859 = vmatprep.subr.bf16.mxu1 %v1103_v59 }
  0x76   :  { %819 = vmatpush2.bf16.msra.mxu0 %v1098_v60  ;;  %860 = vmatpush2.bf16.msra.mxu1 %v1101_v61 }
  0x77   :  { %820 = vmatprep.subr.bf16.mxu0 %v1106_v62  ;;  %861 = vmatprep.subr.bf16.mxu1 %v1109_v63 }
  0x7a   :  { %821 = vmatpush2.bf16.msra.mxu0 %v1104_v0  ;;  %862 = vmatpush2.bf16.msra.mxu1 %v1107_v1  ;;  %v468_v1 = vld [vmem:[%s1350_s6] sm:$0x3] }
  0x7b   :  { %822 = vmatprep.subr.bf16.mxu0 %v1112_v2  ;;  %863 = vmatprep.subr.bf16.mxu1 %v1115_v3  ;;  %v473_v2 = vrot.slane %v468_v1, %v374_v28  ;;  %v477_v3 = vrot.slane %v468_v1, %v378_v33 }
  0x7e   :  { %823 = vmatpush2.bf16.msra.mxu0 %v1110_v4  ;;  %864 = vmatpush2.bf16.msra.mxu1 %v1113_v5 }
  0x7f   :  { %824 = vmatprep.subr.bf16.mxu0 %v1118_v6  ;;  %865 = vmatprep.subr.bf16.mxu1 %v1121_v7 }
  0x82   :  { %825 = vmatpush2.bf16.msra.mxu0 %v1116_v8  ;;  %866 = vmatpush2.bf16.msra.mxu1 %v1119_v9  ;;  %v884_v9 = vld [vmem:[%s1351_s7] sm:$0x3] }
  0x83   :  { %826 = vmatprep.subr.bf16.mxu0 %v1124_v10  ;;  %867 = vmatprep.subr.bf16.mxu1 %v1127_v11 }
  0x86   :  { %827 = vmatpush2.bf16.msra.mxu0 %v1122_v12  ;;  %868 = vmatpush2.bf16.msra.mxu1 %v1125_v13 }
  0x87   :  { %828 = vmatprep.subr.bf16.mxu0 %v1130_v14  ;;  %869 = vmatprep.subr.bf16.mxu1 %v1133_v15 }
  0x8a   :  { %829 = vmatpush2.bf16.msra.mxu0 %v1128_v16  ;;  %870 = vmatpush2.bf16.msra.mxu1 %v1131_v17  ;;  %v889_v16 = vrot.slane %v884_v9, %v374_v28  ;;  %v893_v17 = vrot.slane %v884_v9, %v378_v33 }
  0x8b   :  { %830 = vmatprep.subr.bf16.mxu0 %v1136_v18  ;;  %871 = vmatprep.subr.bf16.mxu1 %v1139_v19 }
  0x8e   :  { %831 = vmatpush2.bf16.msra.mxu0 %v1134_v20  ;;  %872 = vmatpush2.bf16.msra.mxu1 %v1137_v21 }
 0x109   :  { %v197_v24 = vpop.f32.mrf.mxu0  ;;  %v238_v25 = vpop.f32.mrf.mxu1 }
 0x10b   :  { %v199_v26 = vpop.f32.mrf.mxu0  ;;  %v240_v27 = vpop.f32.mrf.mxu1 }
 0x10d   :  { %v201_v30 = vpop.f32.mrf.mxu0  ;;  %v242_v31 = vpop.f32.mrf.mxu1 }
 0x10f   :  { %v202_v35 = vpop.f32.mrf.mxu0  ;;  %v243_v36 = vpop.f32.mrf.mxu1 }
 0x111   :  { %v322_v39 = vpop.f32.mrf.mxu0  ;;  %v363_v40 = vpop.f32.mrf.mxu1 }
 0x112   :  { %v323_v41 = vadd.f32 %v322_v39, %v197_v24  ;;  %v364_v42 = vadd.f32 %v363_v40, %v238_v25  ;;  %v1008_v24 = vld [vmem:[#allocation2] ss:$0 sm:$0xff] }
 0x113   :  { %v324_v45 = vpop.f32.mrf.mxu0  ;;  %v365_v46 = vpop.f32.mrf.mxu1 }
 0x114   :  { %v392_v47 = vadd.f32 %v375_v37, %v323_v41  ;;  %v394_v48 = vadd.f32 %v383_v38, %v364_v42  ;;  %v325_v49 = vadd.f32 %v324_v45, %v199_v26  ;;  %v366_v50 = vadd.f32 %v365_v46, %v240_v27 }
 0x115   :  { %v326_v51 = vpop.f32.mrf.mxu0  ;;  %v367_v52 = vpop.f32.mrf.mxu1 }
 0x116   :  { %v393_v53 = vadd.f32 %v379_v43, %v325_v49  ;;  %v395_v54 = vadd.f32 %v387_v44, %v366_v50  ;;  %v396_v55 = vmax.f32 %v392_v47, 0.0  ;;  %v398_v56 = vmax.f32 %v394_v48, 0.0 }
 0x117   :  { %v327_v57 = vpop.f32.mrf.mxu0  ;;  %v368_v58 = vpop.f32.mrf.mxu1 }
 0x118   :  { %v397_v59 = vmax.f32 %v393_v53, 0.0  ;;  %v399_v60 = vmax.f32 %v395_v54, 0.0  ;;  %v400_v63 = vpack.c.bf16 %v396_v55, %v396_v55  ;;  %v402_v0 = vpack.c.bf16 %v398_v56, %v398_v56 }
 0x11a   :  { %v401_v61 = vpack.c.bf16 %v397_v59, %v397_v59  ;;  %v403_v62 = vpack.c.bf16 %v399_v60, %v399_v60 }
 0x11c   :  { %832 = vmatprep.mubr.bf16.mxu0 %v401_v61  ;;  %873 = vmatprep.mubr.bf16.mxu1 %v403_v62 }
 0x11d   :  { %833 = vmatmul.mubr.bf16.vlgmr.msra.gmra.mxu0 %v400_v63  ;;  %874 = vmatmul.mubr.bf16.vlgmr.msra.gmra.mxu1 %v402_v0 }
 0x1dd   :  { %v834_v4 = vpop.f32.mrf.mxu0  ;;  %v875_v5 = vpop.f32.mrf.mxu1 }
 0x1de   :  { %v835_v6 = vadd.f32 %v834_v4, %v473_v2 }
 0x1df   :  { %v836_v7 = vpop.f32.mrf.mxu0  ;;  %v877_v8 = vpop.f32.mrf.mxu1 }
 0x1e0   :  { %v876_v10 = vadd.f32 %v875_v5, %v835_v6  ;;  %v837_v11 = vadd.f32 %v836_v7, %v477_v3 }
 0x1e1   :  { %v838_v12 = vpop.f32.mrf.mxu0  ;;  %v879_v13 = vpop.f32.mrf.mxu1 }
 0x1e2   :  { %v882_v14 = vmax.f32 %v876_v10, 0.0  ;;  %v878_v15 = vadd.f32 %v877_v8, %v837_v11 }
 0x1e3   :  { %v839_v18 = vpop.f32.mrf.mxu0  ;;  %v880_v19 = vpop.f32.mrf.mxu1 }
 0x1e4   :  { %v883_v20 = vmax.f32 %v878_v15, 0.0  ;;  %v896_v21 = vmul.f32 %v889_v16, %v882_v14 }
 0x1e6   :  { %v897_v22 = vmul.f32 %v893_v17, %v883_v20 }
 0x1e8   :  { %v898_v23 = vadd.f32 %v897_v22, %v896_v21 }
 0x1ea   :  { %899 = vadd.xlane.f32.xlu0 %v898_v23 }
 0x273   :  { %v900_v25 = vpop.xlane.xlu0 %899 }
 0x274   :  { %v908_v26 = vadd.f32 %v1008_v24, %v900_v25 }
 0x276   :  { %v1009_v27 = vmul.f32 -1.442695, %v908_v26 }
 0x278   :  { %1140 = vpow2.f32 %v1009_v27 }
 0x285   :  { %v1141_v29 = vpop.eup %1140 }
 0x286   :  { %v912_v30 = vadd.f32 1.0, %v1141_v29 }
 0x288   :  { %1142 = vrcp.f32 %v912_v30 }
 0x295   :  { %v1143_v31 = vpop.eup %1142 }
 0x296   :  { %916 = vst.msk [vmem:[%s1353_s9] sm:$0xff] %vm915_vm1, %v1143_v31 }
 0x297   :  { %921 = vsyncpa [#allocation4], 1 }
 0x298   :  { %922 = vsyncpa [#allocation6], 1 }
 0x299   :  { %923 = vsyncpa [#allocation9], 1 }

</bundles_post_ra>
